<compile_context>
chip_gen: v6e
topology: v6e:2x2x1
jax: 0.10.0
libtpu: 0.0.40
codegen_flags: <defaults>
</compile_context>

<pallas_src>
import jax
import jax.numpy as jnp
from jax.experimental import pallas as pl
from jax.experimental.pallas import tpu as pltpu


# ----------------------------------------------------------------------------
# Fused kernel: one grid step == one graph view
# ----------------------------------------------------------------------------
def _dmgi_fused_kernel(x_ref, shuf_ref, adj_ref, w_ref, b_ref, a_ref, bd_ref,
                       hparam_ref,
                       h1_out_ref, logits_ref, reg_ref,
                       h1_sum, h2_sum):
    g = pl.program_id(0)
    n = x_ref.shape[0]
    f = x_ref.shape[1]

    x = x_ref[...]            # (N, Fp)   clean features (zero padded)
    xs = shuf_ref[...]        # (N, Fp)   shuffled features
    adj = adj_ref[...]        # (N, N)
    w = w_ref[...]            # (Fp, D)   GCN weight (zero padded rows)
    b = b_ref[...]            # (1, D)    GCN bias

    # GCN, reordered to (adj @ x) @ W and lane-batched over {clean, shuffled}:
    #   one (N,N)@(N,2Fp) MXU op, then one (2N,Fp)@(Fp,D) MXU op.
    ax_cat = jnp.dot(adj, jnp.concatenate([x, xs], axis=1),
                     preferred_element_type=jnp.float32)              # (N, 2Fp)
    ax_stack = jnp.concatenate([ax_cat[:, :f], ax_cat[:, f:]], axis=0)  # (2N, Fp)
    h_both = jnp.maximum(
        jnp.dot(ax_stack, w, preferred_element_type=jnp.float32) + b, 0.0)  # (2N, D)

    h1 = h_both[:n]           # (N, D)  positive branch
    h2 = h_both[n:]           # (N, D)  negative (shuffled) branch

    # Readout: mean over nodes, then sigmoid.
    c = jax.nn.sigmoid(jnp.mean(h1, axis=0, keepdims=True))           # (1, D)

    # Bilinear discriminator: sc[m] = h[m] @ A @ c^T + bd.
    # u[0, i] = sum_j A[i, j] * c[0, j]
    u = jax.lax.dot_general(c, a_ref[...], (((1,), (1,)), ((), ())),
                            preferred_element_type=jnp.float32)       # (1, D)
    # Lane-dense scores for BOTH branches in one dot: (1, 2N) = [sc_1 | sc_2]
    sc = jax.lax.dot_general(u, h_both, (((1,), (1,)), ((), ())),
                             preferred_element_type=jnp.float32) + bd_ref[...]

    h1_out_ref[...] = h1
    logits_ref[...] = sc

    # Accumulate per-graph hidden states for the regularisation loss.
    @pl.when(g == 0)
    def _():
        h1_sum[...] = jnp.zeros_like(h1_sum)
        h2_sum[...] = jnp.zeros_like(h2_sum)

    h1_sum[...] += h1
    h2_sum[...] += h2

    # Finalise reg_loss on the last graph step, entirely from VMEM residents.
    @pl.when(g == pl.num_programs(0) - 1)
    def _():
        g_count = pl.num_programs(0)
        hp = hparam_ref[...]                      # (N, D)  learned H
        d1 = hp - h1_sum[...] / g_count
        d2 = hp - h2_sum[...] / g_count
        pos = jnp.sum(d1 * d1, keepdims=True)     # (1, 1)
        neg = jnp.sum(d2 * d2, keepdims=True)
        reg_ref[...] = pos - neg


# ----------------------------------------------------------------------------
# Wrapper
# ----------------------------------------------------------------------------
def dmgi_forward(params, features, adjs, shufs):
    """features/shufs: lists of (1, N, F_i); adjs: list of (N, N)."""
    G = len(features)
    N = features[0].shape[1]
    D = params["gcn_w"][0].shape[1]
    f_max = max(w.shape[0] for w in params["gcn_w"])
    Fp = ((f_max + 7) // 8) * 8   # common padded feature width

    def pad_feat(x):              # (1, N, F) -> (N, Fp)
        x2 = x[0]
        return jnp.pad(x2, ((0, 0), (0, Fp - x2.shape[1])))

    x_stk = jnp.stack([pad_feat(f) for f in features])                 # (G, N, Fp)
    s_stk = jnp.stack([pad_feat(s) for s in shufs])                    # (G, N, Fp)
    adj_stk = jnp.stack(adjs)                                          # (G, N, N)
    w_stk = jnp.stack([jnp.pad(w, ((0, Fp - w.shape[0]), (0, 0)))
                       for w in params["gcn_w"]])                      # (G, Fp, D)
    b_stk = jnp.stack(params["gcn_b"])                                 # (G, 1, D)
    h_param = params["H"][0]                                           # (N, D)

    h1_out, logits_out, reg_out = pl.pallas_call(
        _dmgi_fused_kernel,
        grid=(G,),
        in_specs=[
            pl.BlockSpec((None, N, Fp), lambda g: (g, 0, 0)),   # features
            pl.BlockSpec((None, N, Fp), lambda g: (g, 0, 0)),   # shuffled features
            pl.BlockSpec((None, N, N), lambda g: (g, 0, 0)),    # adjacency
            pl.BlockSpec((None, Fp, D), lambda g: (g, 0, 0)),   # GCN weight
            pl.BlockSpec((None, 1, D), lambda g: (g, 0, 0)),    # GCN bias
            pl.BlockSpec((D, D), lambda g: (0, 0)),             # disc bilinear W
            pl.BlockSpec((1, 1), lambda g: (0, 0)),             # disc bias
            pl.BlockSpec((N, D), lambda g: (0, 0)),             # H parameter
        ],
        out_specs=(
            pl.BlockSpec((None, N, D), lambda g: (g, 0, 0)),      # h_1 per graph
            pl.BlockSpec((None, 1, 2 * N), lambda g: (g, 0, 0)),  # logits per graph
            pl.BlockSpec((1, 1), lambda g: (0, 0)),               # reg loss
        ),
        out_shape=(
            jax.ShapeDtypeStruct((G, N, D), jnp.float32),
            jax.ShapeDtypeStruct((G, 1, 2 * N), jnp.float32),
            jax.ShapeDtypeStruct((1, 1), jnp.float32),
        ),
        scratch_shapes=[
            pltpu.VMEM((N, D), jnp.float32),   # running sum of h_1 over graphs
            pltpu.VMEM((N, D), jnp.float32),   # running sum of h_2 over graphs
        ],
        compiler_params=pltpu.CompilerParams(
            dimension_semantics=("arbitrary",)),
    )(x_stk, s_stk, adj_stk, w_stk, b_stk,
      params["disc_w"], params["disc_b"], h_param)

    return {
        "h_each": [h1_out[g][None] for g in range(G)],   # list of (1, N, D)
        "logits": [logits_out[g] for g in range(G)],      # list of (1, 2N)
        "reg_loss": reg_out[0, 0],
    }


# ----------------------------------------------------------------------------
# Pure-JAX reference (for correctness check)
# ----------------------------------------------------------------------------
def _ref_forward(params, features, adjs, shufs):
    h1s, h2s, logits = [], [], []
    for i in range(len(features)):
        x, s, adj = features[i][0], shufs[i][0], adjs[i]
        w, b = params["gcn_w"][i], params["gcn_b"][i]
        h1 = jax.nn.relu(adj @ (x @ w) + b)
        h2 = jax.nn.relu(adj @ (s @ w) + b)
        c = jax.nn.sigmoid(jnp.mean(h1, axis=0, keepdims=True))
        v = params["disc_w"] @ c[0]
        sc1 = h1 @ v + params["disc_b"][0, 0]
        sc2 = h2 @ v + params["disc_b"][0, 0]
        logits.append(jnp.concatenate([sc1, sc2])[None])
        h1s.append(h1[None]); h2s.append(h2[None])
    h1m = jnp.mean(jnp.concatenate(h1s, 0), 0)[None]
    h2m = jnp.mean(jnp.concatenate(h2s, 0), 0)[None]
    reg = jnp.sum((params["H"] - h1m) ** 2) - jnp.sum((params["H"] - h2m) ** 2)
    return logits, reg


# ----------------------------------------------------------------------------
# Main
# ----------------------------------------------------------------------------
if __name__ == "__main__":
    # Small config: 2 graphs (views), 64 nodes, per-view input dims 16/24, hidden 32.
    N, D = 64, 32
    dims = [16, 24]
    G = len(dims)

    key = jax.random.PRNGKey(0)

    params = {
        "gcn_w": [jax.random.normal(jax.random.fold_in(key, 10 + i),
                                    (dims[i], D), jnp.float32)
                  * (2.0 / (dims[i] + D)) ** 0.5 for i in range(G)],
        "gcn_b": [jnp.zeros((1, D), jnp.float32) for _ in range(G)],
        "disc_w": jax.random.normal(jax.random.fold_in(key, 20), (D, D), jnp.float32)
                  * (2.0 / (2 * D)) ** 0.5,
        "disc_b": jnp.zeros((1, 1), jnp.float32),
        "H": jax.random.normal(jax.random.fold_in(key, 30), (1, N, D), jnp.float32)
             * (2.0 / (N * D + D)) ** 0.5,      # ~ nn.init.xavier_normal_
    }

    features, adjs, shufs = [], [], []
    for i in range(G):
        kf = jax.random.fold_in(key, 100 + i)
        ka = jax.random.fold_in(key, 200 + i)
        kp = jax.random.fold_in(key, 300 + i)
        feat = jax.random.normal(kf, (1, N, dims[i]), jnp.float32)
        # row-normalized dense adjacency with self-loops
        raw = jax.random.uniform(ka, (N, N), jnp.float32) + jnp.eye(N, dtype=jnp.float32)
        adj = raw / jnp.sum(raw, axis=1, keepdims=True)
        perm = jax.random.permutation(kp, N)
        features.append(feat)
        adjs.append(adj)
        shufs.append(feat[:, perm, :])   # shuffled node features (negative samples)

    result = dmgi_forward(params, features, adjs, shufs)
    jax.block_until_ready(result["reg_loss"])
    for l in result["logits"]:
        jax.block_until_ready(l)

    # Cross-check against a pure-JAX reference
    ref_logits, ref_reg = _ref_forward(params, features, adjs, shufs)
    ok = bool(jnp.allclose(result["reg_loss"], ref_reg, rtol=1e-2, atol=1e-2))
    for lo, lr in zip(result["logits"], ref_logits):
        ok = ok and bool(jnp.allclose(lo, lr, rtol=1e-2, atol=1e-2))
        assert lo.shape == (1, 2 * N)
    for h in result["h_each"]:
        assert h.shape == (1, N, D)
    assert ok, "Pallas output does not match JAX reference"

    print("KERNEL_OK")
</pallas_src>

<mosaic_0001>
module attributes {stable_mosaic.version = 11 : i64} {
  func.func @_dmgi_fused_kernel(%arg0: i32, %arg1: memref<1x64x24xf32, #tpu.memory_space<vmem>>, %arg2: memref<1x64x24xf32, #tpu.memory_space<vmem>>, %arg3: memref<1x64x64xf32, #tpu.memory_space<vmem>>, %arg4: memref<1x24x32xf32, #tpu.memory_space<vmem>>, %arg5: memref<1x1x32xf32, #tpu.memory_space<vmem>>, %arg6: memref<32x32xf32, #tpu.memory_space<vmem>>, %arg7: memref<1x1xf32, #tpu.memory_space<vmem>>, %arg8: memref<64x32xf32, #tpu.memory_space<vmem>>, %arg9: memref<1x64x32xf32, #tpu.memory_space<vmem>>, %arg10: memref<1x1x128xf32, #tpu.memory_space<vmem>>, %arg11: memref<1x1xf32, #tpu.memory_space<vmem>>, %arg12: memref<64x32xf32, #tpu.memory_space<vmem>>, %arg13: memref<64x32xf32, #tpu.memory_space<vmem>>) attributes {dimension_semantics = [#tpu.dimension_semantics<arbitrary>], iteration_bounds = array<i64: 2>, scalar_prefetch = 0 : i64, scratch_operands = 2 : i64, tpu.core_type = #tpu.core_type<tc>, window_params = [{transform_indices = @transform_0, window_bounds = array<i64: 1, 64, 24>}, {transform_indices = @transform_1, window_bounds = array<i64: 1, 64, 24>}, {transform_indices = @transform_2, window_bounds = array<i64: 1, 64, 64>}, {transform_indices = @transform_3, window_bounds = array<i64: 1, 24, 32>}, {transform_indices = @transform_4, window_bounds = array<i64: 1, 1, 32>}, {pipeline_mode = #tpu.pipeline_mode<synchronous>, transform_indices = @transform_5, window_bounds = array<i64: 32, 32>}, {pipeline_mode = #tpu.pipeline_mode<synchronous>, transform_indices = @transform_6, window_bounds = array<i64: 1, 1>}, {pipeline_mode = #tpu.pipeline_mode<synchronous>, transform_indices = @transform_7, window_bounds = array<i64: 64, 32>}, {transform_indices = @transform_8, window_bounds = array<i64: 1, 64, 32>}, {transform_indices = @transform_9, window_bounds = array<i64: 1, 1, 128>}, {pipeline_mode = #tpu.pipeline_mode<synchronous>, transform_indices = @transform_10, window_bounds = array<i64: 1, 1>}]} {
    %c0 = arith.constant 0 : index
    %c0_0 = arith.constant 0 : index
    %c0_1 = arith.constant 0 : index
    %0 = vector.load %arg1[%c0, %c0_0, %c0_1] : memref<1x64x24xf32, #tpu.memory_space<vmem>>, vector<1x64x24xf32>
    %1 = vector.shape_cast %0 : vector<1x64x24xf32> to vector<64x24xf32>
    %c0_2 = arith.constant 0 : index
    %c0_3 = arith.constant 0 : index
    %c0_4 = arith.constant 0 : index
    %2 = vector.load %arg2[%c0_2, %c0_3, %c0_4] : memref<1x64x24xf32, #tpu.memory_space<vmem>>, vector<1x64x24xf32>
    %3 = vector.shape_cast %2 : vector<1x64x24xf32> to vector<64x24xf32>
    %c0_5 = arith.constant 0 : index
    %c0_6 = arith.constant 0 : index
    %c0_7 = arith.constant 0 : index
    %4 = vector.load %arg3[%c0_5, %c0_6, %c0_7] : memref<1x64x64xf32, #tpu.memory_space<vmem>>, vector<1x64x64xf32>
    %5 = vector.shape_cast %4 : vector<1x64x64xf32> to vector<64x64xf32>
    %c0_8 = arith.constant 0 : index
    %c0_9 = arith.constant 0 : index
    %c0_10 = arith.constant 0 : index
    %6 = vector.load %arg4[%c0_8, %c0_9, %c0_10] : memref<1x24x32xf32, #tpu.memory_space<vmem>>, vector<1x24x32xf32>
    %7 = vector.shape_cast %6 : vector<1x24x32xf32> to vector<24x32xf32>
    %c0_11 = arith.constant 0 : index
    %c0_12 = arith.constant 0 : index
    %c0_13 = arith.constant 0 : index
    %8 = vector.load %arg5[%c0_11, %c0_12, %c0_13] : memref<1x1x32xf32, #tpu.memory_space<vmem>>, vector<1x1x32xf32>
    %9 = vector.shape_cast %8 : vector<1x1x32xf32> to vector<1x32xf32>
    %10 = tpu.concatenate %1, %3 in 1 : vector<64x24xf32>, vector<64x24xf32> -> vector<64x48xf32>
    %cst = arith.constant dense<0.000000e+00> : vector<64x48xf32>
    %11 = tpu.matmul %5, %10, %cst {dimension_numbers = #tpu.dot_dimension_numbers<[1], [0], [0], [1], [0, 0, 1, 1], [], []>} : vector<64x64xf32>, vector<64x48xf32>, vector<64x48xf32> -> vector<64x48xf32>
    %12 = vector.extract_strided_slice %11 {offsets = [0, 0], sizes = [64, 24], strides = [1, 1]} : vector<64x48xf32> to vector<64x24xf32>
    %13 = vector.extract_strided_slice %11 {offsets = [0, 24], sizes = [64, 24], strides = [1, 1]} : vector<64x48xf32> to vector<64x24xf32>
    %14 = tpu.concatenate %12, %13 in 0 : vector<64x24xf32>, vector<64x24xf32> -> vector<128x24xf32>
    %cst_14 = arith.constant dense<0.000000e+00> : vector<128x32xf32>
    %15 = tpu.matmul %14, %7, %cst_14 {dimension_numbers = #tpu.dot_dimension_numbers<[1], [0], [0], [1], [0, 0, 1, 1], [], []>} : vector<128x24xf32>, vector<24x32xf32>, vector<128x32xf32> -> vector<128x32xf32>
    %16 = vector.broadcast %9 : vector<1x32xf32> to vector<128x32xf32>
    %17 = arith.addf %15, %16 : vector<128x32xf32>
    %cst_15 = arith.constant 0.000000e+00 : f32
    %18 = vector.broadcast %cst_15 : f32 to vector<128x32xf32>
    %19 = arith.maximumf %17, %18 : vector<128x32xf32>
    %20 = vector.extract_strided_slice %19 {offsets = [0, 0], sizes = [64, 32], strides = [1, 1]} : vector<128x32xf32> to vector<64x32xf32>
    %21 = vector.extract_strided_slice %19 {offsets = [64, 0], sizes = [64, 32], strides = [1, 1]} : vector<128x32xf32> to vector<64x32xf32>
    %cst_16 = arith.constant dense<0.000000e+00> : vector<32xf32>
    %22 = vector.multi_reduction <add>, %20, %cst_16 [0] : vector<64x32xf32> to vector<32xf32>
    %23 = vector.shape_cast %22 : vector<32xf32> to vector<1x32xf32>
    %cst_17 = arith.constant 6.400000e+01 : f32
    %24 = vector.broadcast %cst_17 : f32 to vector<1x32xf32>
    %25 = arith.divf %23, %24 : vector<1x32xf32>
    %26 = arith.negf %25 : vector<1x32xf32>
    %27 = math.exp %26 : vector<1x32xf32>
    %cst_18 = arith.constant 1.000000e+00 : f32
    %28 = vector.broadcast %cst_18 : f32 to vector<1x32xf32>
    %29 = arith.addf %28, %27 : vector<1x32xf32>
    %30 = arith.divf %28, %29 : vector<1x32xf32>
    %c0_19 = arith.constant 0 : index
    %c0_20 = arith.constant 0 : index
    %31 = vector.load %arg6[%c0_19, %c0_20] : memref<32x32xf32, #tpu.memory_space<vmem>>, vector<32x32xf32>
    %cst_21 = arith.constant dense<0.000000e+00> : vector<1x32xf32>
    %32 = tpu.matmul %30, %31, %cst_21 {dimension_numbers = #tpu.dot_dimension_numbers<[1], [1], [0], [0], [0, 0, 1, 0], [], []>} : vector<1x32xf32>, vector<32x32xf32>, vector<1x32xf32> -> vector<1x32xf32>
    %cst_22 = arith.constant dense<0.000000e+00> : vector<1x128xf32>
    %33 = tpu.matmul %32, %19, %cst_22 {dimension_numbers = #tpu.dot_dimension_numbers<[1], [1], [0], [0], [0, 0, 1, 0], [], []>} : vector<1x32xf32>, vector<128x32xf32>, vector<1x128xf32> -> vector<1x128xf32>
    %c0_23 = arith.constant 0 : index
    %c0_24 = arith.constant 0 : index
    %34 = vector.load %arg7[%c0_23, %c0_24] : memref<1x1xf32, #tpu.memory_space<vmem>>, vector<1x1xf32>
    %35 = vector.broadcast %34 : vector<1x1xf32> to vector<1x128xf32>
    %36 = arith.addf %33, %35 : vector<1x128xf32>
    %c0_25 = arith.constant 0 : index
    %c0_26 = arith.constant 0 : index
    %c0_27 = arith.constant 0 : index
    %37 = vector.load %arg9[%c0_25, %c0_26, %c0_27] : memref<1x64x32xf32, #tpu.memory_space<vmem>>, vector<1x64x32xf32>
    %38 = vector.shape_cast %37 : vector<1x64x32xf32> to vector<64x32xf32>
    %39 = vector.shape_cast %20 : vector<64x32xf32> to vector<1x64x32xf32>
    tpu.vector_store %arg9[%c0_25, %c0_26, %c0_27], %39 {strides = array<i32>} : memref<1x64x32xf32, #tpu.memory_space<vmem>>, vector<1x64x32xf32>,
    %c0_28 = arith.constant 0 : index
    %c0_29 = arith.constant 0 : index
    %c0_30 = arith.constant 0 : index
    %40 = vector.load %arg10[%c0_28, %c0_29, %c0_30] : memref<1x1x128xf32, #tpu.memory_space<vmem>>, vector<1x1x128xf32>
    %41 = vector.shape_cast %40 : vector<1x1x128xf32> to vector<1x128xf32>
    %42 = vector.shape_cast %36 : vector<1x128xf32> to vector<1x1x128xf32>
    tpu.vector_store %arg10[%c0_28, %c0_29, %c0_30], %42 {strides = array<i32>} : memref<1x1x128xf32, #tpu.memory_space<vmem>>, vector<1x1x128xf32>,
    %c0_i32 = arith.constant 0 : i32
    %43 = arith.cmpi eq, %arg0, %c0_i32 : i32
    %44 = arith.extui %43 : i1 to i32
    %c0_i32_31 = arith.constant 0 : i32
    %45 = arith.cmpi ne, %44, %c0_i32_31 : i32
    scf.if %45 {
      %cst_41 = arith.constant 0.000000e+00 : f32
      %55 = vector.broadcast %cst_41 : f32 to vector<64x32xf32>
      %c0_42 = arith.constant 0 : index
      %c0_43 = arith.constant 0 : index
      %56 = vector.load %arg12[%c0_42, %c0_43] : memref<64x32xf32, #tpu.memory_space<vmem>>, vector<64x32xf32>
      tpu.vector_store %arg12[%c0_42, %c0_43], %55 {strides = array<i32>} : memref<64x32xf32, #tpu.memory_space<vmem>>, vector<64x32xf32>,
      %cst_44 = arith.constant 0.000000e+00 : f32
      %57 = vector.broadcast %cst_44 : f32 to vector<64x32xf32>
      %c0_45 = arith.constant 0 : index
      %c0_46 = arith.constant 0 : index
      %58 = vector.load %arg13[%c0_45, %c0_46] : memref<64x32xf32, #tpu.memory_space<vmem>>, vector<64x32xf32>
      tpu.vector_store %arg13[%c0_45, %c0_46], %57 {strides = array<i32>} : memref<64x32xf32, #tpu.memory_space<vmem>>, vector<64x32xf32>,
    } else {
    }
    %c0_32 = arith.constant 0 : index
    %c0_33 = arith.constant 0 : index
    %46 = vector.load %arg12[%c0_32, %c0_33] : memref<64x32xf32, #tpu.memory_space<vmem>>, vector<64x32xf32>
    %47 = arith.addf %46, %20 : vector<64x32xf32>
    %c0_34 = arith.constant 0 : index
    %c0_35 = arith.constant 0 : index
    %48 = vector.load %arg12[%c0_34, %c0_35] : memref<64x32xf32, #tpu.memory_space<vmem>>, vector<64x32xf32>
    tpu.vector_store %arg12[%c0_34, %c0_35], %47 {strides = array<i32>} : memref<64x32xf32, #tpu.memory_space<vmem>>, vector<64x32xf32>,
    %c0_36 = arith.constant 0 : index
    %c0_37 = arith.constant 0 : index
    %49 = vector.load %arg13[%c0_36, %c0_37] : memref<64x32xf32, #tpu.memory_space<vmem>>, vector<64x32xf32>
    %50 = arith.addf %49, %21 : vector<64x32xf32>
    %c0_38 = arith.constant 0 : index
    %c0_39 = arith.constant 0 : index
    %51 = vector.load %arg13[%c0_38, %c0_39] : memref<64x32xf32, #tpu.memory_space<vmem>>, vector<64x32xf32>
    tpu.vector_store %arg13[%c0_38, %c0_39], %50 {strides = array<i32>} : memref<64x32xf32, #tpu.memory_space<vmem>>, vector<64x32xf32>,
    %c1_i32 = arith.constant 1 : i32
    %52 = arith.cmpi eq, %arg0, %c1_i32 : i32
    %53 = arith.extui %52 : i1 to i32
    %c0_i32_40 = arith.constant 0 : i32
    %54 = arith.cmpi ne, %53, %c0_i32_40 : i32
    scf.if %54 {
      %c0_41 = arith.constant 0 : index
      %c0_42 = arith.constant 0 : index
      %55 = vector.load %arg8[%c0_41, %c0_42] : memref<64x32xf32, #tpu.memory_space<vmem>>, vector<64x32xf32>
      %c0_43 = arith.constant 0 : index
      %c0_44 = arith.constant 0 : index
      %56 = vector.load %arg12[%c0_43, %c0_44] : memref<64x32xf32, #tpu.memory_space<vmem>>, vector<64x32xf32>
      %cst_45 = arith.constant 2.000000e+00 : f32
      %57 = vector.broadcast %cst_45 : f32 to vector<64x32xf32>
      %58 = arith.divf %56, %57 : vector<64x32xf32>
      %59 = arith.subf %55, %58 : vector<64x32xf32>
      %c0_46 = arith.constant 0 : index
      %c0_47 = arith.constant 0 : index
      %60 = vector.load %arg13[%c0_46, %c0_47] : memref<64x32xf32, #tpu.memory_space<vmem>>, vector<64x32xf32>
      %cst_48 = arith.constant 2.000000e+00 : f32
      %61 = vector.broadcast %cst_48 : f32 to vector<64x32xf32>
      %62 = arith.divf %60, %61 : vector<64x32xf32>
      %63 = arith.subf %55, %62 : vector<64x32xf32>
      %64 = arith.mulf %59, %59 : vector<64x32xf32>
      %65 = vector.shape_cast %64 : vector<64x32xf32> to vector<1x64x32xf32>
      %cst_49 = arith.constant dense<0.000000e+00> : vector<1xf32>
      %66 = vector.multi_reduction <add>, %65, %cst_49 [1, 2] : vector<1x64x32xf32> to vector<1xf32>
      %67 = vector.shape_cast %66 : vector<1xf32> to vector<1x1x1xf32>
      %68 = vector.extract %67[0, 0, 0] : f32 from vector<1x1x1xf32>
      %69 = vector.broadcast %68 : f32 to vector<1x1xf32>
      %70 = arith.mulf %63, %63 : vector<64x32xf32>
      %71 = vector.shape_cast %70 : vector<64x32xf32> to vector<1x64x32xf32>
      %cst_50 = arith.constant dense<0.000000e+00> : vector<1xf32>
      %72 = vector.multi_reduction <add>, %71, %cst_50 [1, 2] : vector<1x64x32xf32> to vector<1xf32>
      %73 = vector.shape_cast %72 : vector<1xf32> to vector<1x1x1xf32>
      %74 = vector.extract %73[0, 0, 0] : f32 from vector<1x1x1xf32>
      %75 = vector.broadcast %74 : f32 to vector<1x1xf32>
      %76 = arith.subf %69, %75 : vector<1x1xf32>
      %c0_51 = arith.constant 0 : index
      %c0_52 = arith.constant 0 : index
      %77 = vector.load %arg11[%c0_51, %c0_52] : memref<1x1xf32, #tpu.memory_space<vmem>>, vector<1x1xf32>
      tpu.vector_store %arg11[%c0_51, %c0_52], %76 {strides = array<i32>} : memref<1x1xf32, #tpu.memory_space<vmem>>, vector<1x1xf32>,
    } else {
    }
    return
  }
  func.func @transform_0(%arg0: i32) -> (i32, i32, i32) {
    %c0_i32 = arith.constant 0 : i32
    %c0_i32_0 = arith.constant 0 : i32
    %c0_i32_1 = arith.constant 0 : i32
    return %arg0, %c0_i32, %c0_i32_0 : i32, i32, i32
  }
  func.func @transform_1(%arg0: i32) -> (i32, i32, i32) {
    %c0_i32 = arith.constant 0 : i32
    %c0_i32_0 = arith.constant 0 : i32
    %c0_i32_1 = arith.constant 0 : i32
    return %arg0, %c0_i32, %c0_i32_0 : i32, i32, i32
  }
  func.func @transform_2(%arg0: i32) -> (i32, i32, i32) {
    %c0_i32 = arith.constant 0 : i32
    %c0_i32_0 = arith.constant 0 : i32
    %c0_i32_1 = arith.constant 0 : i32
    return %arg0, %c0_i32, %c0_i32_0 : i32, i32, i32
  }
  func.func @transform_3(%arg0: i32) -> (i32, i32, i32) {
    %c0_i32 = arith.constant 0 : i32
    %c0_i32_0 = arith.constant 0 : i32
    %c0_i32_1 = arith.constant 0 : i32
    return %arg0, %c0_i32, %c0_i32_0 : i32, i32, i32
  }
  func.func @transform_4(%arg0: i32) -> (i32, i32, i32) {
    %c0_i32 = arith.constant 0 : i32
    %c0_i32_0 = arith.constant 0 : i32
    %c0_i32_1 = arith.constant 0 : i32
    return %arg0, %c0_i32, %c0_i32_0 : i32, i32, i32
  }
  func.func @transform_5(%arg0: i32) -> (i32, i32) {
    %c0_i32 = arith.constant 0 : i32
    %c0_i32_0 = arith.constant 0 : i32
    %c0_i32_1 = arith.constant 0 : i32
    return %c0_i32, %c0_i32_0 : i32, i32
  }
  func.func @transform_6(%arg0: i32) -> (i32, i32) {
    %c0_i32 = arith.constant 0 : i32
    %c0_i32_0 = arith.constant 0 : i32
    %c0_i32_1 = arith.constant 0 : i32
    return %c0_i32, %c0_i32_0 : i32, i32
  }
  func.func @transform_7(%arg0: i32) -> (i32, i32) {
    %c0_i32 = arith.constant 0 : i32
    %c0_i32_0 = arith.constant 0 : i32
    %c0_i32_1 = arith.constant 0 : i32
    return %c0_i32, %c0_i32_0 : i32, i32
  }
  func.func @transform_8(%arg0: i32) -> (i32, i32, i32) {
    %c0_i32 = arith.constant 0 : i32
    %c0_i32_0 = arith.constant 0 : i32
    %c0_i32_1 = arith.constant 0 : i32
    return %arg0, %c0_i32, %c0_i32_0 : i32, i32, i32
  }
  func.func @transform_9(%arg0: i32) -> (i32, i32, i32) {
    %c0_i32 = arith.constant 0 : i32
    %c0_i32_0 = arith.constant 0 : i32
    %c0_i32_1 = arith.constant 0 : i32
    return %arg0, %c0_i32, %c0_i32_0 : i32, i32, i32
  }
  func.func @transform_10(%arg0: i32) -> (i32, i32) {
    %c0_i32 = arith.constant 0 : i32
    %c0_i32_0 = arith.constant 0 : i32
    %c0_i32_1 = arith.constant 0 : i32
    return %c0_i32, %c0_i32_0 : i32, i32
  }
}

</mosaic_0001>

<bundles_post_ra>
// kernel: tpu_custom_call.1
= control target key start
LH: loop header
LB: loop body
LE: loop exit
PB: predicated region body
PF: predicated region fallthrough
CT: control target
= control target key end

     0   :  { %s2430_s0 = inlined_call_operand.vmem [shape: f32[2,64,24], index: 0, kind: input, shape index: {}]   ;;  %s2431_s1 = inlined_call_operand.vmem [shape: f32[2,64,24], index: 1, kind: input, shape index: {}]   ;;  %s2432_s2 = inlined_call_operand.vmem [shape: f32[2,64,64], index: 2, kind: input, shape index: {}]   ;;  %s2433_s3 = inlined_call_operand.vmem [shape: f32[2,24,32], index: 3, kind: input, shape index: {}]   ;;  %s2434_s4 = inlined_call_operand.vmem [shape: f32[2,1,32], index: 4, kind: input, shape index: {}]   ;;  %s2435_s5 = inlined_call_operand.vmem [shape: f32[32,32], index: 5, kind: input, shape index: {}]   ;;  %s2436_s6 = inlined_call_operand.<no memory space> [shape: f32[1,1], index: 6, kind: input, shape index: {}]   ;;  %s2437_s7 = inlined_call_operand.vmem [shape: f32[64,32], index: 7, kind: input, shape index: {}]   ;;  %s2438_s8 = inlined_call_operand.vmem [shape: f32[2,64,32], index: 8, kind: output, shape index: {0}]   ;;  %s2439_s9 = inlined_call_operand.hbm [shape: f32[2,1,128], index: 9, kind: output, shape index: {1}]   ;;  %s2440_s10 = inlined_call_operand.hbm [shape: f32[1,1], index: 10, kind: output, shape index: {2}]  }
   0x1   :  { %2442 = sst [smem:[#allocation11_spill]] %s2430_s0  ;;  %v16_v0 = vstv %s2436_s6 }
   0x2   :  { %17 = vst [vmem:[#allocation4] sm:$0x1] %v16_v0 }
   0x3   :  { %18 = vsyncpa [#allocation6], 0 }
   0x4   :  { %20 = vsyncpa [#allocation6 + $0x1], 0 }
   0x5   :  { %21 = vsyncpa [#allocation8], 0  ;;  %s1942_s15 = smov 0   ;;  %s1944_s16 = smov 0  }
   0x6   :  { %s1946_s17 = smov 0   ;;  %s1948_s18 = smov 0  }
   0x7 LB: > { %s1963_s6 = sadd.s32 4294967295, %s1874_s18   ;;  %s1491_s19 = sadd.s32 4294967294, %s1874_s18   ;;  %s1874_s18 = sphi %s1948_s18, %s2454_s18   ;;  %s1870_s17 = sphi %s1946_s17, %s2453_s17   ;;  %s1866_s16 = sphi %s1944_s16, %s2452_s16   ;;  %s1862_s15 = sphi %s1942_s15, %s2451_s15  }
   0x8   : > { %s1967_s20 = sadd.s32 1, %s1874_s18   ;;  %s253_s21 = sadd.s32 1, %s1870_s17 }
   0x9   : > { %s250_s22 = ssub.s32 %s1874_s18, %s1967_s20  ;;  %p263_p0 = scmp.ne.s32.totalorder %s1870_s17, %s1866_s16 }
   0xa   : > { %p251_p1 = scmp.eq.s32.totalorder %s250_s22, 0  ;;  %p2441_p2 = scmp.eq.s32.totalorder %s1963_s6, 1 }
   0xb   : > { %p269_p3 = scmp.ne.s32.totalorder %s1866_s16, %s1862_s15  ;;  %p270_p4 = scmp.eq.s32.totalorder %s1491_s19, 1 }
   0xc   : > { %s1978_s23 = scalar_select %p251_p1, %s1870_s17, %s253_s21  }
   0xd   : > { %p1982_p5 = por %p2441_p2, %p263_p0  ;;  %p1986_p6 = por %p270_p4, %p269_p3 }
   0xe   : > { %p1494_p7 = scmp.ge.s32.totalorder %s1874_s18, 1  ;;  %p356_p8 = scmp.lt.s32.totalorder %s1874_s18, 3 }
   0xf   : > { %s2444_s25 = scalar_select %p1986_p6, 1, 0 }
  0x10   : > { %p357_p9 = pnand %p1494_p7, %p356_p8 }
  0x11   : > { %p416_p10 = scmp.lt.s32.totalorder (!%p357_p9), %s1963_s6, 1  ;;  %s1876_s11 = smov (!%p357_p9), 24  }
  0x12   : > { %360 = sbr.rel (%p357_p9) target bundleno = 1307 (0x51b), region = 52  ;;  %s2445_s0 = sld [smem:[#allocation11_spill]] (!%p357_p9) }
  0x13   : > { %s1877_s12 = smov (!%p357_p9), 104   ;;  %p1552_p11 = scmp.ne.s32.totalorder (!%p357_p9), %s1963_s6, 0 }
  0x17   : > { %s1994_s26 = scalar_select %p416_p10, %s1963_s6, 1  ;;  %vm513_vm0 = vcmask 523264   ;;  %vm504_vm1 = vcmask 195584   ;;  %v1878_v56 = vmov 0.0   ;;  %v899_v57 = vld [vmem:[%s2435_s5 + $0x18] sm:$0xff]  ;;  %vm866_vm2 = vcmask 261120  }
  0x18   : > { %1689 = vmatprep.subr.mxu1 %v1878_v56  ;;  %v898_v60 = vld [vmem:[%s2435_s5 + $0x10] sm:$0xff]  ;;  %vm1879_vm3 = vmmov 0   ;;  %v897_v62 = vld [vmem:[%s2435_s5 + $0x8] sm:$0xff]  ;;  %v896_v0 = vld [vmem:[%s2435_s5] sm:$0xff] }
  0x19   : > { %s1997_s27 = sshll.u32 %s1994_s26, 6  ;;  %s1724_s28 = smul.u32 24, %s1994_s26  ;;  %1721 = vmatprep.mubr.msk.f32.mxu1 %vm1879_vm3, %v1878_v56 }
  0x1a   : > { %s425_s30 = scalar_lea.vmem %s2431_s1, %s1997_s27  ;;  %s2007_s14 = scalar_lea.vmem %s2432_s2, %s1997_s27 }
  0x1b   : > { %v459_v1 = vld [vmem:[%s425_s30 + $0x38] sm:$0xff]  ;;  %v457_v2 = vld [vmem:[%s425_s30 + $0x28] sm:$0xff]  ;;  %v458_v3 = vld [vmem:[%s425_s30 + $0x30] sm:$0xff]  ;;  %s2015_s22 = scalar_lea.vmem %s2445_s0, %s1997_s27  ;;  %s438_s13 = scalar_lea.vmem %s2434_s4, %s1994_s26 }
  0x1c   : > { %494 = vrot.lane.b32.xlu0 %v459_v1, %s1876_s11  ;;  %490 = vrot.lane.b32.xlu1 %v457_v2, %s1876_s11  ;;  %v456_v4 = vld [vmem:[%s425_s30 + $0x20] sm:$0xff]  ;;  %v455_v5 = vld [vmem:[%s425_s30 + $0x18] sm:$0xff]  ;;  %s2101_s21 = scalar_lea.vmem %s2438_s8, %s1997_s27  ;;  %s412_s26 = sand.u32 1, %s1866_s16  }
  0x1d   : > { %v454_v6 = vld [vmem:[%s425_s30 + $0x10] sm:$0xff]  ;;  %v460_v7 = vld [vmem:[%s2007_s14] sm:$0xff]  ;;  %v453_v8 = vld [vmem:[%s425_s30 + $0x8] sm:$0xff]  ;;  %s2258_s27 = scalar_lea.vmem [#allocation5], %s412_s26 }
  0x1e   : > { %1636 = vmatprep.mubr.msk.f32.mxu0 %vm513_vm0, %v460_v7  ;;  %v452_v9 = vld [vmem:[%s425_s30] sm:$0xff]  ;;  %v451_v10 = vld [vmem:[%s2015_s22 + $0x38] sm:$0xff]  ;;  %v450_v14 = vld [vmem:[%s2015_s22 + $0x30] sm:$0xff] }
  0x1f   : > { %v449_v17 = vld [vmem:[%s2015_s22 + $0x28] sm:$0xff]  ;;  %v448_v18 = vld [vmem:[%s2015_s22 + $0x20] sm:$0xff]  ;;  %v447_v20 = vld [vmem:[%s2015_s22 + $0x18] sm:$0xff] }
  0x20   : > { %492 = vrot.lane.b32.xlu0 %v458_v3, %s1876_s11  ;;  %488 = vrot.lane.b32.xlu1 %v456_v4, %s1876_s11  ;;  %v446_v25 = vld [vmem:[%s2015_s22 + $0x10] sm:$0xff]  ;;  %v445_v27 = vld [vmem:[%s2015_s22 + $0x8] sm:$0xff] }
  0x21   : > { %v444_v31 = vld [vmem:[%s2015_s22] sm:$0xff]  ;;  %v461_v34 = vld [vmem:[%s2007_s14 + $0x8] sm:$0xff]  ;;  %v462_v36 = vld [vmem:[%s2007_s14 + $0x10] sm:$0xff] }
  0x22   : > { %v463_v38 = vld [vmem:[%s2007_s14 + $0x18] sm:$0xff]  ;;  %v464_v40 = vld [vmem:[%s2007_s14 + $0x20] sm:$0xff]  ;;  %v465_v41 = vld [vmem:[%s2007_s14 + $0x28] sm:$0xff] }
  0x23   : > { %v466_v42 = vld [vmem:[%s2007_s14 + $0x30] sm:$0xff]  ;;  %v467_v43 = vld [vmem:[%s2007_s14 + $0x38] sm:$0xff]  ;;  %v2094_v1 = vld [vmem:[%s438_s13] ss:$0 sm:$0xff] }
  0x24   : > { %486 = vrot.lane.b32.xlu0 %v455_v5, %s1876_s11  ;;  %484 = vrot.lane.b32.xlu1 %v454_v6, %s1876_s11 }
  0x28   : > { %482 = vrot.lane.b32.xlu0 %v453_v8, %s1876_s11  ;;  %480 = vrot.lane.b32.xlu1 %v452_v9, %s1876_s11  ;;  %s435_s11 = scalar_lea.vmem %s2433_s3, %s1724_s28 }
  0x29   : > { %v470_v35 = vld [vmem:[%s435_s11 + $0x10] sm:$0xff]  ;;  %v469_v37 = vld [vmem:[%s435_s11 + $0x8] sm:$0xff]  ;;  %v468_v39 = vld [vmem:[%s435_s11] sm:$0xff] }
  0x8e   : > { %v495_v11 = vpop.permute.xlu0 %494  ;;  %v491_v12 = vpop.permute.xlu1 %490 }
  0x8f   : > { %v512_v13 = vsel %vm504_vm1, %v451_v10, %v495_v11  ;;  %v510_v21 = vsel %vm504_vm1, %v449_v17, %v491_v12 }
  0x90   : > { %1620 = vmatprep.subr.mxu0 %v512_v13 }
  0x91   : > { %1621 = vmatpush3.msra.mxu0 %v512_v13 }
  0x92   : > { %v493_v15 = vpop.permute.xlu0 %492  ;;  %v489_v16 = vpop.permute.xlu1 %488 }
  0x93   : > { %v511_v19 = vsel %vm504_vm1, %v450_v14, %v493_v15  ;;  %v509_v22 = vsel %vm504_vm1, %v448_v18, %v489_v16 }
  0x94   : > { %1622 = vmatprep.subr.mxu0 %v511_v19 }
  0x95   : > { %1623 = vmatpush3.msra.mxu0 %v511_v19 }
  0x96   : > { %1624 = vmatprep.subr.mxu0 %v510_v21  ;;  %v487_v23 = vpop.permute.xlu0 %486  ;;  %v485_v24 = vpop.permute.xlu1 %484 }
  0x97   : > { %1625 = vmatpush3.msra.mxu0 %v510_v21  ;;  %v508_v26 = vsel %vm504_vm1, %v447_v20, %v487_v23  ;;  %v507_v28 = vsel %vm504_vm1, %v446_v25, %v485_v24 }
  0x98   : > { %1626 = vmatprep.subr.mxu0 %v509_v22 }
  0x99   : > { %1627 = vmatpush3.msra.mxu0 %v509_v22 }
  0x9a   : > { %1628 = vmatprep.subr.mxu0 %v508_v26  ;;  %v483_v29 = vpop.permute.xlu0 %482  ;;  %v481_v30 = vpop.permute.xlu1 %480 }
  0x9b   : > { %1629 = vmatpush3.msra.mxu0 %v508_v26  ;;  %v506_v32 = vsel %vm504_vm1, %v445_v27, %v483_v29  ;;  %v505_v33 = vsel %vm504_vm1, %v444_v31, %v481_v30 }
  0x9c   : > { %1630 = vmatprep.subr.mxu0 %v507_v28 }
  0x9d   : > { %1631 = vmatpush3.msra.mxu0 %v507_v28 }
  0x9e   : > { %1632 = vmatprep.subr.mxu0 %v506_v32 }
  0x9f   : > { %1633 = vmatpush3.msra.mxu0 %v506_v32 }
  0xa0   : > { %1634 = vmatprep.subr.mxu0 %v505_v33 }
  0xa1   : > { %1635 = vmatpush3.msra.mxu0 %v505_v33 }
  0xa2   : > { %1637 = vmatmul.mubr.msk.f32.vlgmr.msra.gmra.mxu0 %vm513_vm0, %v461_v34  ;;  %1648 = vmatprep.subr.mxu0 %v470_v35 }
  0xa3   : > { %1639 = vmatprep.mubr.msk.f32.mxu0 %vm513_vm0, %v462_v36  ;;  %1649 = vmatpush3.msra.mxu0 %v470_v35 }
  0xa4   : > { %1650 = vmatprep.subr.mxu0 %v469_v37 }
  0xa5   : > { %1651 = vmatpush3.msra.mxu0 %v469_v37 }
  0xa6   : > { %1640 = vmatmul.mubr.msk.f32.gmra.mxu0 %vm513_vm0, %v463_v38  ;;  %1652 = vmatprep.subr.mxu0 %v468_v39 }
  0xa7   : > { %1642 = vmatprep.mubr.msk.f32.mxu0 %vm513_vm0, %v464_v40  ;;  %1653 = vmatpush3.msra.mxu0 %v468_v39 }
  0xa8   : > { %1678 = vmatprep.subr.mxu0 %v1878_v56 }
  0xaa   : > { %1643 = vmatmul.mubr.msk.f32.gmra.mxu0 %vm513_vm0, %v465_v41 }
  0xab   : > { %1645 = vmatprep.mubr.msk.f32.mxu0 %vm513_vm0, %v466_v42 }
  0xae   : > { %1646 = vmatmul.mubr.msk.f32.gmra.mxu0 %vm513_vm0, %v467_v43 }
 0x162   : > { %v1638_v44 = vpop.f32.mrf.mxu0 }
 0x163   : > { %653 = vrot.lane.b32.xlu1 %v1638_v44, %s1877_s12 }
 0x164   : > { %v604_v45 = vpop.f32.mrf.mxu0 }
 0x165   : > { %651 = vrot.lane.b32.xlu0 %v604_v45, %s1877_s12  ;;  %1654 = vmatprep.mubr.msk.f32.mxu0 %vm504_vm1, %v604_v45 }
 0x166   : > { %v1641_v46 = vpop.f32.mrf.mxu0  ;;  %1655 = vmatmul.mubr.msk.f32.vlgmr.msra.gmra.mxu0 %vm504_vm1, %v1638_v44 }
 0x167   : > { %657 = vrot.lane.b32.xlu1 %v1641_v46, %s1877_s12  ;;  %1679 = vmatpush3.xpose.msk.msra.mxu0 %vm866_vm2, %v899_v57 }
 0x168   : > { %v614_v47 = vpop.f32.mrf.mxu0  ;;  %1680 = vmatprep.subr.mxu0 %v1878_v56 }
 0x169   : > { %655 = vrot.lane.b32.xlu0 %v614_v47, %s1877_s12  ;;  %1657 = vmatprep.mubr.msk.f32.mxu0 %vm504_vm1, %v614_v47 }
 0x16a   : > { %v1644_v48 = vpop.f32.mrf.mxu0  ;;  %1658 = vmatmul.mubr.msk.f32.gmra.mxu0 %vm504_vm1, %v1641_v46 }
 0x16b   : > { %661 = vrot.lane.b32.xlu1 %v1644_v48, %s1877_s12  ;;  %1681 = vmatpush3.xpose.msk.msra.mxu0 %vm866_vm2, %v898_v60 }
 0x16c   : > { %v624_v49 = vpop.f32.mrf.mxu0  ;;  %1682 = vmatprep.subr.mxu0 %v1878_v56 }
 0x16d   : > { %659 = vrot.lane.b32.xlu0 %v624_v49, %s1877_s12  ;;  %1660 = vmatprep.mubr.msk.f32.mxu0 %vm504_vm1, %v624_v49 }
 0x16e   : > { %v1647_v50 = vpop.f32.mrf.mxu0  ;;  %1661 = vmatmul.mubr.msk.f32.gmra.mxu0 %vm504_vm1, %v1644_v48 }
 0x16f   : > { %665 = vrot.lane.b32.xlu1 %v1647_v50, %s1877_s12  ;;  %1683 = vmatpush3.xpose.msk.msra.mxu0 %vm866_vm2, %v897_v62 }
 0x170   : > { %v634_v51 = vpop.f32.mrf.mxu0  ;;  %1684 = vmatprep.subr.mxu0 %v1878_v56 }
 0x171   : > { %663 = vrot.lane.b32.xlu0 %v634_v51, %s1877_s12  ;;  %1663 = vmatprep.mubr.msk.f32.mxu0 %vm504_vm1, %v634_v51 }
 0x172   : > { %1664 = vmatmul.mubr.msk.f32.gmra.mxu0 %vm504_vm1, %v1647_v50 }
 0x173   : > { %1685 = vmatpush3.xpose.msk.msra.mxu0 %vm866_vm2, %v896_v0 }
 0x1d5   : > { %v654_v52 = vpop.permute.xlu1 %653 }
 0x1d7   : > { %v652_v53 = vpop.permute.xlu0 %651 }
 0x1d8   : > { %1666 = vmatprep.mubr.msk.f32.mxu0 %vm504_vm1, %v652_v53 }
 0x1d9   : > { %v658_v54 = vpop.permute.xlu1 %657  ;;  %1667 = vmatmul.mubr.msk.f32.gmra.mxu0 %vm504_vm1, %v654_v52 }
 0x1db   : > { %v656_v55 = vpop.permute.xlu0 %655 }
 0x1dc   : > { %1669 = vmatprep.mubr.msk.f32.mxu0 %vm504_vm1, %v656_v55 }
 0x1dd   : > { %1670 = vmatmul.mubr.msk.f32.gmra.mxu0 %vm504_vm1, %v658_v54  ;;  %v662_v58 = vpop.permute.xlu1 %661 }
 0x1df   : > { %v660_v59 = vpop.permute.xlu0 %659 }
 0x1e0   : > { %1672 = vmatprep.mubr.msk.f32.mxu0 %vm504_vm1, %v660_v59 }
 0x1e1   : > { %1673 = vmatmul.mubr.msk.f32.gmra.mxu0 %vm504_vm1, %v662_v58  ;;  %v666_v63 = vpop.permute.xlu1 %665 }
 0x1e3   : > { %v664_v61 = vpop.permute.xlu0 %663 }
 0x1e4   : > { %1675 = vmatprep.mubr.msk.f32.mxu0 %vm504_vm1, %v664_v61 }
 0x1e5   : > { %1676 = vmatmul.mubr.msk.f32.gmra.mxu0 %vm504_vm1, %v666_v63 }
 0x1e6   : > { %1686 = vmatprep.mubr.msk.f32.mxu0 %vm1879_vm3, %v1878_v56 }
 0x226   : > { %v1656_v2 = vpop.f32.mrf.mxu0 }
 0x227   : > { %v777_v3 = vadd.f32 %v1656_v2, %v2094_v1 }
 0x228   : > { %v771_v4 = vpop.f32.mrf.mxu0 }
 0x229   : > { %v2103_v5 = vmax.f32 %v777_v3, 0.0  ;;  %v772_v6 = vadd.f32 %v2094_v1, %v771_v4  ;;  %v985_v3 = vld [vmem:[#allocation4] sm:$0x1]  ;;  %v1880_v4 = vmov 0  }
 0x22a   : > { %v1659_v7 = vpop.f32.mrf.mxu0  ;;  %1781 = vset.pattern.permute.xlu0 %v1880_v4 }
 0x22b   : > { %1117 = vst.msk [vmem:[%s2101_s21 + $0x8] sm:$0xff] %vm866_vm2, %v2103_v5  ;;  %v2109_v8 = vmax.f32 %v772_v6, 0.0  ;;  %v787_v9 = vadd.f32 %v1659_v7, %v2094_v1  ;;  %v868_v15 = vsel %vm866_vm2, %v2103_v5, 0.0  ;;  %988 = vperm.xlu0 %1781, %v985_v3  }
 0x22c   : > { %v781_v10 = vpop.f32.mrf.mxu0 }
 0x22d   : > { %v867_v11 = vsel %vm866_vm2, %v2109_v8, 0.0  ;;  %1116 = vst.msk [vmem:[%s2101_s21] sm:$0xff] %vm866_vm2, %v2109_v8  ;;  %v2117_v12 = vmax.f32 %v787_v9, 0.0  ;;  %v782_v13 = vadd.f32 %v2094_v1, %v781_v10 }
 0x22e   : > { %v1662_v14 = vpop.f32.mrf.mxu0  ;;  %v869_v18 = vadd.f32 %v868_v15, %v867_v11 }
 0x22f   : > { %1119 = vst.msk [vmem:[%s2101_s21 + $0x18] sm:$0xff] %vm866_vm2, %v2117_v12  ;;  %v2125_v16 = vmax.f32 %v782_v13, 0.0  ;;  %v797_v17 = vadd.f32 %v1662_v14, %v2094_v1  ;;  %v872_v25 = vsel %vm866_vm2, %v2117_v12, 0.0 }
 0x230   : > { %v791_v19 = vpop.f32.mrf.mxu0 }
 0x231   : > { %v870_v20 = vsel %vm866_vm2, %v2125_v16, 0.0  ;;  %1118 = vst.msk [vmem:[%s2101_s21 + $0x10] sm:$0xff] %vm866_vm2, %v2125_v16  ;;  %v2133_v21 = vmax.f32 %v797_v17, 0.0  ;;  %v792_v22 = vadd.f32 %v2094_v1, %v791_v19 }
 0x232   : > { %v871_v23 = vadd.f32 %v870_v20, %v869_v18  ;;  %v1665_v24 = vpop.f32.mrf.mxu0 }
 0x233   : > { %1121 = vst.msk [vmem:[%s2101_s21 + $0x28] sm:$0xff] %vm866_vm2, %v2133_v21  ;;  %v2141_v26 = vmax.f32 %v792_v22, 0.0  ;;  %v807_v27 = vadd.f32 %v1665_v24, %v2094_v1  ;;  %v876_v34 = vsel %vm866_vm2, %v2133_v21, 0.0  ;;  %v991_v22 = vlaneseq }
 0x234   : > { %v873_v28 = vadd.f32 %v872_v25, %v871_v23  ;;  %v801_v29 = vpop.f32.mrf.mxu0 }
 0x235   : > { %v874_v30 = vsel %vm866_vm2, %v2141_v26, 0.0  ;;  %1120 = vst.msk [vmem:[%s2101_s21 + $0x20] sm:$0xff] %vm866_vm2, %v2141_v26  ;;  %v2149_v31 = vmax.f32 %v807_v27, 0.0  ;;  %v802_v32 = vadd.f32 %v2094_v1, %v801_v29  ;;  %v992_v23 = vshrl.u32 %v991_v22, 7 }
 0x236   : > { %v875_v33 = vadd.f32 %v874_v30, %v873_v28 }
 0x237   : > { %1123 = vst.msk [vmem:[%s2101_s21 + $0x38] sm:$0xff] %vm866_vm2, %v2149_v31  ;;  %v2157_v35 = vmax.f32 %v802_v32, 0.0  ;;  %v880_v39 = vsel %vm866_vm2, %v2149_v31, 0.0  ;;  %v993_v24 = vsub.s32 0, %v992_v23 }
 0x238   : > { %v877_v36 = vadd.f32 %v876_v34, %v875_v33 }
 0x239   : > { %v878_v37 = vsel %vm866_vm2, %v2157_v35, 0.0  ;;  %1122 = vst.msk [vmem:[%s2101_s21 + $0x30] sm:$0xff] %vm866_vm2, %v2157_v35 }
 0x23a   : > { %v879_v38 = vadd.f32 %v878_v37, %v877_v36 }
 0x23c   : > { %v881_v40 = vadd.f32 %v880_v39, %v879_v38 }
 0x23e   : > { %v882_v41 = vrot.slane %v881_v40, 4 }
 0x240   : > { %v883_v42 = vadd.f32 %v882_v41, %v881_v40 }
 0x242   : > { %v884_v43 = vrot.slane %v883_v42, 2 }
 0x244   : > { %v885_v44 = vadd.f32 %v884_v43, %v883_v42 }
 0x246   : > { %v886_v45 = vrot.slane %v885_v44, 1 }
 0x248   : > { %v887_v46 = vadd.f32 %v886_v45, %v885_v44 }
 0x24a   : > { %v1529_v47 = vmul.f32 -0.015625, %v887_v46 }
 0x24c   : > { %v891_v48 = vmul.f32 1.442695, %v1529_v47 }
 0x24e   : > { %1782 = vpow2.f32 %v891_v48 }
 0x25b   : > { %v1783_v49 = vpop.eup %1782 }
 0x25c   : > { %v893_v50 = vadd.f32 1.0, %v1783_v49 }
 0x25e   : > { %1784 = vrcp.f32 %v893_v50 }
 0x26b   : > { %v1785_v51 = vpop.eup %1784 }
 0x26c   : > { %1687 = vmatmul.mubr.msk.f32.vlgmr.msra.gmra.mxu0 %vm866_vm2, %v1785_v51 }
 0x299   : > { %v1668_v52 = vpop.f32.mrf.mxu0 }
 0x29a   : > { %v2211_v14 = vadd.f32 %v1668_v52, %v2094_v1 }
 0x29b   : > { %v811_v53 = vpop.f32.mrf.mxu0 }
 0x29c   : > { %v859_v17 = vmax.f32 %v2211_v14, 0.0  ;;  %v2220_v18 = vadd.f32 %v2094_v1, %v811_v53 }
 0x29d   : > { %v1671_v54 = vpop.f32.mrf.mxu0 }
 0x29e   : > { %v2195_v9 = vadd.f32 %v1671_v54, %v2094_v1  ;;  %v858_v19 = vmax.f32 %v2220_v18, 0.0 }
 0x29f   : > { %v821_v55 = vpop.f32.mrf.mxu0 }
 0x2a0   : > { %v861_v11 = vmax.f32 %v2195_v9, 0.0  ;;  %v2204_v13 = vadd.f32 %v2094_v1, %v821_v55 }
 0x2a1   : > { %v1674_v57 = vpop.f32.mrf.mxu0 }
 0x2a2   : > { %v2179_v0 = vadd.f32 %v1674_v57, %v2094_v1  ;;  %v860_v15 = vmax.f32 %v2204_v13, 0.0 }
 0x2a3   : > { %v831_v58 = vpop.f32.mrf.mxu0 }
 0x2a4   : > { %v863_v6 = vmax.f32 %v2179_v0, 0.0  ;;  %v2188_v7 = vadd.f32 %v2094_v1, %v831_v58 }
 0x2a5   : > { %v1677_v59 = vpop.f32.mrf.mxu0 }
 0x2a6   : > { %v2168_v60 = vadd.f32 %v1677_v59, %v2094_v1  ;;  %v862_v10 = vmax.f32 %v2188_v7, 0.0  ;;  %v989_v25 = vpop.permute.xlu0 %988 }
 0x2a7   : > { %v841_v61 = vpop.f32.mrf.mxu0  ;;  %v994_v27 = vrot.slane %v989_v25, %v993_v24 }
 0x2a8   : > { %v865_v62 = vmax.f32 %v2168_v60, 0.0  ;;  %v2172_v63 = vadd.f32 %v2094_v1, %v841_v61 }
 0x2aa   : > { %1690 = vmatpush3.xpose.msk.msra.mxu1 %vm866_vm2, %v865_v62  ;;  %v864_v2 = vmax.f32 %v2172_v63, 0.0 }
 0x2ab   : > { %1691 = vmatprep.subr.mxu1 %v1878_v56 }
 0x2ae   : > { %1692 = vmatpush3.xpose.msk.msra.mxu1 %vm866_vm2, %v864_v2 }
 0x2af   : > { %1693 = vmatprep.subr.mxu1 %v1878_v56 }
 0x2b2   : > { %1694 = vmatpush3.xpose.msk.msra.mxu1 %vm866_vm2, %v863_v6 }
 0x2b3   : > { %1695 = vmatprep.subr.mxu1 %v1878_v56 }
 0x2b6   : > { %1696 = vmatpush3.xpose.msk.msra.mxu1 %vm866_vm2, %v862_v10 }
 0x2b7   : > { %1697 = vmatprep.subr.mxu1 %v1878_v56 }
 0x2ba   : > { %1698 = vmatpush3.xpose.msk.msra.mxu1 %vm866_vm2, %v861_v11 }
 0x2bb   : > { %1699 = vmatprep.subr.mxu1 %v1878_v56 }
 0x2be   : > { %1700 = vmatpush3.xpose.msk.msra.mxu1 %vm866_vm2, %v860_v15 }
 0x2bf   : > { %1701 = vmatprep.subr.mxu1 %v1878_v56 }
 0x2c2   : > { %1702 = vmatpush3.xpose.msk.msra.mxu1 %vm866_vm2, %v859_v17 }
 0x2c3   : > { %1703 = vmatprep.subr.mxu1 %v1878_v56 }
 0x2c6   : > { %1704 = vmatpush3.xpose.msk.msra.mxu1 %vm866_vm2, %v858_v19 }
 0x2c7   : > { %1705 = vmatprep.subr.mxu1 %v1878_v56 }
 0x2ca   : > { %1706 = vmatpush3.xpose.msk.msra.mxu1 %vm866_vm2, %v2149_v31 }
 0x2cb   : > { %1707 = vmatprep.subr.mxu1 %v1878_v56 }
 0x2ce   : > { %1708 = vmatpush3.xpose.msk.msra.mxu1 %vm866_vm2, %v2157_v35 }
 0x2cf   : > { %1709 = vmatprep.subr.mxu1 %v1878_v56 }
 0x2d2   : > { %1710 = vmatpush3.xpose.msk.msra.mxu1 %vm866_vm2, %v2133_v21 }
 0x2d3   : > { %1711 = vmatprep.subr.mxu1 %v1878_v56 }
 0x2d6   : > { %1712 = vmatpush3.xpose.msk.msra.mxu1 %vm866_vm2, %v2141_v26 }
 0x2d7   : > { %1713 = vmatprep.subr.mxu1 %v1878_v56 }
 0x2da   : > { %1714 = vmatpush3.xpose.msk.msra.mxu1 %vm866_vm2, %v2117_v12 }
 0x2db   : > { %1715 = vmatprep.subr.mxu1 %v1878_v56 }
 0x2de   : > { %1716 = vmatpush3.xpose.msk.msra.mxu1 %vm866_vm2, %v2125_v16 }
 0x2df   : > { %1717 = vmatprep.subr.mxu1 %v1878_v56 }
 0x2e2   : > { %1718 = vmatpush3.xpose.msk.msra.mxu1 %vm866_vm2, %v2103_v5 }
 0x2e3   : > { %1719 = vmatprep.subr.mxu1 %v1878_v56 }
 0x2e6   : > { %1720 = vmatpush3.xpose.msk.msra.mxu1 %vm866_vm2, %v2109_v8 }
 0x32c   : > { %v981_v1 = vpop.f32.mrf.mxu0 }
 0x32d   : > { %1722 = vmatmul.mubr.msk.f32.vlgmr.msra.gmra.mxu1 %vm866_vm2, %v981_v1 }
 0x32e   : > { %v1688_v20 = vpop.f32.mrf.mxu0 }
 0x3ec   : > { %1128 = sbr.rel (%p1552_p11) target bundleno = 1018 (0x3fa), region = 56 }
 0x3ed   : > { %v1112_v28 = vpop.f32.mrf.mxu1 }
 0x3ee   : > { %v1113_v29 = vadd.f32 %v1112_v28, %v994_v27 }
 0x3ef   : > { %v1723_v30 = vpop.f32.mrf.mxu1 }
 0x3f0   : > { %1124 = vst [vmem:[%s2258_s27] sm:$0x1] %v1113_v29 }
 0x3f1   : > { %v1881_v56 = vmov 0.0  }
 0x3f2   : > { %1129 = vst.msk [vmem:[#allocation2] sm:$0xff] %vm866_vm2, %v1881_v56  ;;  %1130 = vst.msk [vmem:[#allocation2 + $0x8] sm:$0xff] %vm866_vm2, %v1881_v56 }
 0x3f3   : > { %1131 = vst.msk [vmem:[#allocation2 + $0x10] sm:$0xff] %vm866_vm2, %v1881_v56  ;;  %1132 = vst.msk [vmem:[#allocation2 + $0x18] sm:$0xff] %vm866_vm2, %v1881_v56 }
 0x3f4   : > { %1133 = vst.msk [vmem:[#allocation2 + $0x20] sm:$0xff] %vm866_vm2, %v1881_v56  ;;  %1134 = vst.msk [vmem:[#allocation2 + $0x28] sm:$0xff] %vm866_vm2, %v1881_v56 }
 0x3f5   : > { %1135 = vst.msk [vmem:[#allocation2 + $0x30] sm:$0xff] %vm866_vm2, %v1881_v56  ;;  %1136 = vst.msk [vmem:[#allocation2 + $0x38] sm:$0xff] %vm866_vm2, %v1881_v56 }
 0x3f6   : > { %1137 = vst.msk [vmem:[#allocation3] sm:$0xff] %vm866_vm2, %v1881_v56  ;;  %1138 = vst.msk [vmem:[#allocation3 + $0x8] sm:$0xff] %vm866_vm2, %v1881_v56 }
 0x3f7   : > { %1139 = vst.msk [vmem:[#allocation3 + $0x10] sm:$0xff] %vm866_vm2, %v1881_v56  ;;  %1140 = vst.msk [vmem:[#allocation3 + $0x18] sm:$0xff] %vm866_vm2, %v1881_v56 }
 0x3f8   : > { %1141 = vst.msk [vmem:[#allocation3 + $0x20] sm:$0xff] %vm866_vm2, %v1881_v56  ;;  %1142 = vst.msk [vmem:[#allocation3 + $0x28] sm:$0xff] %vm866_vm2, %v1881_v56 }
 0x3f9   : > { %1143 = vst.msk [vmem:[#allocation3 + $0x30] sm:$0xff] %vm866_vm2, %v1881_v56  ;;  %1144 = vst.msk [vmem:[#allocation3 + $0x38] sm:$0xff] %vm866_vm2, %v1881_v56 }
 0x3fa PF: > { %v1145_v32 = vld [vmem:[#allocation2] sm:$0xff]  ;;  %v1146_v33 = vld [vmem:[#allocation2 + $0x8] sm:$0xff]  ;;  %v1147_v34 = vld [vmem:[#allocation2 + $0x10] sm:$0xff]  ;;  %p1553_p12 = scmp.ne.s32.totalorder %s1963_s6, 1 }
 0x3fb   : > { %v1153_v36 = vadd.f32 %v1145_v32, %v2109_v8  ;;  %v1154_v37 = vadd.f32 %v1146_v33, %v2103_v5  ;;  %v1155_v38 = vadd.f32 %v1147_v34, %v2125_v16  ;;  %v1148_v39 = vld [vmem:[#allocation2 + $0x18] sm:$0xff]  ;;  %v1149_v40 = vld [vmem:[#allocation2 + $0x20] sm:$0xff]  ;;  %v1150_v41 = vld [vmem:[#allocation2 + $0x28] sm:$0xff] }
 0x3fc   : > { %v1156_v42 = vadd.f32 %v1148_v39, %v2117_v12  ;;  %v1157_v43 = vadd.f32 %v1149_v40, %v2141_v26  ;;  %v1158_v44 = vadd.f32 %v1150_v41, %v2133_v21  ;;  %v1151_v45 = vld [vmem:[#allocation2 + $0x30] sm:$0xff]  ;;  %v1152_v46 = vld [vmem:[#allocation2 + $0x38] sm:$0xff] }
 0x3fd   : > { %v1169_v47 = vld [vmem:[#allocation3] sm:$0xff]  ;;  %1161 = vst.msk [vmem:[#allocation2] sm:$0xff] %vm866_vm2, %v1153_v36  ;;  %1162 = vst.msk [vmem:[#allocation2 + $0x8] sm:$0xff] %vm866_vm2, %v1154_v37  ;;  %v1159_v5 = vadd.f32 %v1151_v45, %v2157_v35  ;;  %v1160_v8 = vadd.f32 %v1152_v46, %v2149_v31  ;;  %v1170_v16 = vld [vmem:[#allocation3 + $0x8] sm:$0xff] }
 0x3fe   : > { %1163 = vst.msk [vmem:[#allocation2 + $0x10] sm:$0xff] %vm866_vm2, %v1155_v38  ;;  %v1177_v12 = vadd.f32 %v1169_v47, %v858_v19  ;;  %v1171_v26 = vld [vmem:[#allocation3 + $0x10] sm:$0xff]  ;;  %v1172_v48 = vld [vmem:[#allocation3 + $0x18] sm:$0xff]  ;;  %1164 = vst.msk [vmem:[#allocation2 + $0x18] sm:$0xff] %vm866_vm2, %v1156_v42  ;;  %v1178_v21 = vadd.f32 %v1170_v16, %v859_v17 }
 0x3ff   : > { %1165 = vst.msk [vmem:[#allocation2 + $0x20] sm:$0xff] %vm866_vm2, %v1157_v43  ;;  %1166 = vst.msk [vmem:[#allocation2 + $0x28] sm:$0xff] %vm866_vm2, %v1158_v44  ;;  %v1179_v35 = vadd.f32 %v1171_v26, %v860_v15  ;;  %v1180_v31 = vadd.f32 %v1172_v48, %v861_v11  ;;  %v1173_v49 = vld [vmem:[#allocation3 + $0x20] sm:$0xff]  ;;  %v1174_v50 = vld [vmem:[#allocation3 + $0x28] sm:$0xff] }
 0x400   : > { %v1175_v51 = vld [vmem:[#allocation3 + $0x30] sm:$0xff]  ;;  %1167 = vst.msk [vmem:[#allocation2 + $0x30] sm:$0xff] %vm866_vm2, %v1159_v5  ;;  %1168 = vst.msk [vmem:[#allocation2 + $0x38] sm:$0xff] %vm866_vm2, %v1160_v8  ;;  %v1181_v52 = vadd.f32 %v1173_v49, %v862_v10  ;;  %v1182_v53 = vadd.f32 %v1174_v50, %v863_v6  ;;  %v1176_v55 = vld [vmem:[#allocation3 + $0x38] sm:$0xff]  ;;  %1196 = sbr.rel (%p1553_p12) target bundleno = 1265 (0x4f1), region = 60 }
 0x401   : > { %1185 = vst.msk [vmem:[#allocation3] sm:$0xff] %vm866_vm2, %v1177_v12  ;;  %v1183_v54 = vadd.f32 %v1175_v51, %v864_v2  ;;  %1186 = vst.msk [vmem:[#allocation3 + $0x8] sm:$0xff] %vm866_vm2, %v1178_v21  ;;  %v1184_v57 = vadd.f32 %v1176_v55, %v865_v62 }
 0x402   : > { %1187 = vst.msk [vmem:[#allocation3 + $0x10] sm:$0xff] %vm866_vm2, %v1179_v35  ;;  %1188 = vst.msk [vmem:[#allocation3 + $0x18] sm:$0xff] %vm866_vm2, %v1180_v31 }
 0x403   : > { %1189 = vst.msk [vmem:[#allocation3 + $0x20] sm:$0xff] %vm866_vm2, %v1181_v52  ;;  %1190 = vst.msk [vmem:[#allocation3 + $0x28] sm:$0xff] %vm866_vm2, %v1182_v53 }
 0x404   : > { %1191 = vst.msk [vmem:[#allocation3 + $0x30] sm:$0xff] %vm866_vm2, %v1183_v54  ;;  %1192 = vst.msk [vmem:[#allocation3 + $0x38] sm:$0xff] %vm866_vm2, %v1184_v57 }
 0x405   : > { %v1197_v58 = vld [vmem:[%s2437_s7] sm:$0xff]  ;;  %v1198_v59 = vld [vmem:[%s2437_s7 + $0x8] sm:$0xff]  ;;  %v2328_v60 = vld [vmem:[%s2437_s7 + $0x10] sm:$0xff]  ;;  %vm1321_vm4 = vcmask 0  }
 0x406   : > { %v2333_v61 = vld [vmem:[%s2437_s7 + $0x18] sm:$0xff]  ;;  %v2338_v62 = vld [vmem:[%s2437_s7 + $0x20] sm:$0xff]  ;;  %v2343_v63 = vld [vmem:[%s2437_s7 + $0x28] sm:$0xff] }
 0x407   : > { %v2348_v0 = vld [vmem:[%s2437_s7 + $0x30] sm:$0xff]  ;;  %v1205_v2 = vld [vmem:[#allocation2] sm:$0xff]  ;;  %v1206_v3 = vld [vmem:[#allocation2 + $0x8] sm:$0xff] }
 0x408   : > { %v1207_v4 = vld [vmem:[#allocation2 + $0x10] sm:$0xff]  ;;  %v1208_v6 = vld [vmem:[#allocation2 + $0x18] sm:$0xff]  ;;  %v1214_v7 = vmul.f32 0.5, %v1205_v2  ;;  %v1209_v9 = vld [vmem:[#allocation2 + $0x20] sm:$0xff]  ;;  %v1215_v13 = vmul.f32 0.5, %v1206_v3 }
 0x409   : > { %v1210_v10 = vld [vmem:[#allocation2 + $0x28] sm:$0xff]  ;;  %v1211_v11 = vld [vmem:[#allocation2 + $0x30] sm:$0xff]  ;;  %v1216_v14 = vmul.f32 0.5, %v1207_v4  ;;  %v1217_v15 = vmul.f32 0.5, %v1208_v6  ;;  %v2353_v17 = vld [vmem:[%s2437_s7 + $0x38] sm:$0xff]  ;;  %v1218_v19 = vmul.f32 0.5, %v1209_v9 }
 0x40a   : > { %v1212_v18 = vld [vmem:[#allocation2 + $0x38] sm:$0xff]  ;;  %v1219_v1 = vmul.f32 0.5, %v1210_v10  ;;  %v1220_v20 = vmul.f32 0.5, %v1211_v11  ;;  %v1222_v22 = vsub.f32 %v1197_v58, %v1214_v7  ;;  %v1223_v24 = vsub.f32 %v1198_v59, %v1215_v13  ;;  %v1230_v38 = vld [vmem:[#allocation3] sm:$0xff]  ;;  %v1231_v39 = vld [vmem:[#allocation3 + $0x8] sm:$0xff] }
 0x40b   : > { %v1221_v23 = vmul.f32 0.5, %v1212_v18  ;;  %v1224_v25 = vsub.f32 %v2328_v60, %v1216_v14  ;;  %v1225_v27 = vsub.f32 %v2333_v61, %v1217_v15  ;;  %v1226_v28 = vsub.f32 %v2338_v62, %v1218_v19  ;;  %v1232_v40 = vld [vmem:[#allocation3 + $0x10] sm:$0xff]  ;;  %v1233_v44 = vld [vmem:[#allocation3 + $0x18] sm:$0xff]  ;;  %v1234_v45 = vld [vmem:[#allocation3 + $0x20] sm:$0xff] }
 0x40c   : > { %v1227_v29 = vsub.f32 %v2343_v63, %v1219_v1  ;;  %v1228_v30 = vsub.f32 %v2348_v0, %v1220_v20  ;;  %v1254_v56 = vmul.f32 %v1222_v22, %v1222_v22  ;;  %v1255_v33 = vmul.f32 %v1223_v24, %v1223_v24  ;;  %v1235_v46 = vld [vmem:[#allocation3 + $0x28] sm:$0xff]  ;;  %v1236_v16 = vld [vmem:[#allocation3 + $0x30] sm:$0xff]  ;;  %v1237_v49 = vld [vmem:[#allocation3 + $0x38] sm:$0xff] }
 0x40d   : > { %v1229_v32 = vsub.f32 %v2353_v17, %v1221_v23  ;;  %v1256_v34 = vmul.f32 %v1224_v25, %v1224_v25  ;;  %v1257_v36 = vmul.f32 %v1225_v27, %v1225_v27  ;;  %v1258_v41 = vmul.f32 %v1226_v28, %v1226_v28 }
 0x40e   : > { %v1262_v37 = vsel %vm866_vm2, %v1254_v56, 0.0  ;;  %v1263_v42 = vsel %vm866_vm2, %v1255_v33, 0.0  ;;  %v1259_v47 = vmul.f32 %v1227_v29, %v1227_v29  ;;  %v1260_v5 = vmul.f32 %v1228_v30, %v1228_v30 }
 0x40f   : > { %v1265_v43 = vsel %vm866_vm2, %v1256_v34, 0.0  ;;  %v1261_v8 = vmul.f32 %v1229_v32, %v1229_v32  ;;  %v1264_v12 = vadd.f32 %v1263_v42, %v1262_v37  ;;  %v1267_v26 = vsel %vm866_vm2, %v1257_v36, 0.0 }
 0x410   : > { %v1238_v48 = vmul.f32 0.5, %v1230_v38  ;;  %v1239_v21 = vmul.f32 0.5, %v1231_v39  ;;  %v1240_v35 = vmul.f32 0.5, %v1232_v40  ;;  %v1241_v50 = vmul.f32 0.5, %v1233_v44 }
 0x411   : > { %v1266_v31 = vadd.f32 %v1265_v43, %v1264_v12  ;;  %v1242_v51 = vmul.f32 0.5, %v1234_v45  ;;  %v1243_v52 = vmul.f32 0.5, %v1235_v46  ;;  %v1269_v53 = vsel %vm866_vm2, %v1258_v41, 0.0 }
 0x412   : > { %v1244_v54 = vmul.f32 0.5, %v1236_v16  ;;  %v1246_v55 = vsub.f32 %v1197_v58, %v1238_v48  ;;  %v1247_v57 = vsub.f32 %v1198_v59, %v1239_v21  ;;  %v1248_v3 = vsub.f32 %v2328_v60, %v1240_v35 }
 0x413   : > { %v1268_v2 = vadd.f32 %v1267_v26, %v1266_v31  ;;  %v1249_v4 = vsub.f32 %v2333_v61, %v1241_v50  ;;  %v1250_v6 = vsub.f32 %v2338_v62, %v1242_v51  ;;  %v1271_v7 = vsel %vm866_vm2, %v1259_v47, 0.0 }
 0x414   : > { %v1245_v9 = vmul.f32 0.5, %v1237_v49  ;;  %v1251_v10 = vsub.f32 %v2343_v63, %v1243_v52  ;;  %v1287_v11 = vmul.f32 %v1246_v55, %v1246_v55  ;;  %v1288_v14 = vmul.f32 %v1247_v57, %v1247_v57 }
 0x415   : > { %v1270_v13 = vadd.f32 %v1269_v53, %v1268_v2  ;;  %v1289_v15 = vmul.f32 %v1248_v3, %v1248_v3  ;;  %v1290_v18 = vmul.f32 %v1249_v4, %v1249_v4  ;;  %v1273_v58 = vsel %vm866_vm2, %v1260_v5, 0.0 }
 0x416   : > { %v1252_v59 = vsub.f32 %v2348_v0, %v1244_v54  ;;  %v1291_v19 = vmul.f32 %v1250_v6, %v1250_v6  ;;  %v1295_v61 = vsel %vm866_vm2, %v1287_v11, 0.0  ;;  %v1296_v62 = vsel %vm866_vm2, %v1288_v14, 0.0 }
 0x417   : > { %v1272_v60 = vadd.f32 %v1271_v7, %v1270_v13  ;;  %v1298_v1 = vsel %vm866_vm2, %v1289_v15, 0.0  ;;  %v1275_v20 = vsel %vm866_vm2, %v1261_v8, 0.0  ;;  %v1297_v63 = vadd.f32 %v1296_v62, %v1295_v61 }
 0x418   : > { %v1253_v23 = vsub.f32 %v2353_v17, %v1245_v9  ;;  %v1292_v24 = vmul.f32 %v1251_v10, %v1251_v10  ;;  %v1300_v25 = vsel %vm866_vm2, %v1290_v18, 0.0  ;;  %v1293_v0 = vmul.f32 %v1252_v59, %v1252_v59 }
 0x419   : > { %v1274_v22 = vadd.f32 %v1273_v58, %v1272_v60  ;;  %v1299_v27 = vadd.f32 %v1298_v1, %v1297_v63  ;;  %v1302_v29 = vsel %vm866_vm2, %v1291_v19, 0.0 }
 0x41a   : > { %v1294_v56 = vmul.f32 %v1253_v23, %v1253_v23  ;;  %v1304_v32 = vsel %vm866_vm2, %v1292_v24, 0.0  ;;  %v1306_v34 = vsel %vm866_vm2, %v1293_v0, 0.0 }
 0x41b   : > { %v1276_v28 = vadd.f32 %v1275_v20, %v1274_v22  ;;  %v1301_v30 = vadd.f32 %v1300_v25, %v1299_v27 }
 0x41c   : > { %v1308_v37 = vsel %vm866_vm2, %v1294_v56, 0.0 }
 0x41d   : > { %1277 = vadd.xlane.f32.xlu0 %v1276_v28  ;;  %v1303_v33 = vadd.f32 %v1302_v29, %v1301_v30 }
 0x41f   : > { %v1305_v36 = vadd.f32 %v1304_v32, %v1303_v33 }
 0x421   : > { %v1307_v17 = vadd.f32 %v1306_v34, %v1305_v36 }
 0x423   : > { %v1309_v38 = vadd.f32 %v1308_v37, %v1307_v17 }
 0x425   : > { %1310 = vadd.xlane.f32.xlu0 %v1309_v38 }
 0x4a6   : > { %v1278_v39 = vpop.xlane.xlu0 %1277 }
 0x4a7   : > { %v1279_v40 = vrot.slane %v1278_v39, 4 }
 0x4a9   : > { %v1280_v41 = vadd.f32 %v1279_v40, %v1278_v39 }
 0x4ab   : > { %v1281_v42 = vrot.slane %v1280_v41, 2 }
 0x4ad   : > { %v1282_v43 = vadd.f32 %v1281_v42, %v1280_v41 }
 0x4ae   : > { %v1311_v44 = vpop.xlane.xlu0 %1310 }
 0x4af   : > { %v1283_v45 = vrot.slane %v1282_v43, 1  ;;  %v1312_v46 = vrot.slane %v1311_v44, 4 }
 0x4b1   : > { %v1284_v47 = vadd.f32 %v1283_v45, %v1282_v43  ;;  %v1313_v5 = vadd.f32 %v1312_v46, %v1311_v44 }
 0x4b3   : > { %1725 = vpush %v1284_v47  ;;  %v1314_v8 = vrot.slane %v1313_v5, 2 }
 0x4b5   : > { %v1315_v12 = vadd.f32 %v1314_v8, %v1313_v5 }
 0x4b7   : > { %v1316_v16 = vrot.slane %v1315_v12, 1 }
 0x4b9   : > { %v1317_v26 = vadd.f32 %v1316_v16, %v1315_v12 }
 0x4bb   : > { %1727 = vpush %v1317_v26 }
 0x4e4   : > { %s1726_s13 = spop %1725 }
 0x4e5   : > { %v1286_v48 = vstv %s1726_s13 }
 0x4ec   : > { %s1728_s14 = spop %1727 }
 0x4ed   : > { %v1319_v21 = vstv %s1728_s14 }
 0x4ee   : > { %v1320_v35 = vsub.f32 %v1286_v48, %v1319_v21 }
 0x4f0   : > { %1322 = vst.msk [vmem:[#allocation7] sm:$0x1] %vm1321_vm4, %v1320_v35 }
 0x4f1 PF: > { %s1554_s19 = sshll.u32 %s1963_s6, 4  ;;  %s1344_s29 = sshll.u32 %s2258_s27, 4  ;;  %s1345_s29 = int_to_ptr.vmem [resolvable:$true] %s1344_s29 }
 0x4f2   : > { %s1342_s28 = scalar_lea.hbm %s2439_s9, %s1554_s19  ;;  %s1329_s30 = scalar_lea.sflag [#allocation6], %s412_s26 }
 0x4f3   : > { %s1786_s11 = scalar_lea.vmem %s1345_s29, 16  ;;  %s1882_s12 = smov [#allocation5]  }
 0x4f4   : > { %p1787_p13 = scmp.ne.s32.totalorder %s1345_s29, %s1786_s11  ;;  %s1790_s13 = sshll.u32 %s1882_s12, 4  ;;  %s1791_s13 = int_to_ptr.vmem [resolvable:$false] %s1790_s13 }
 0x4f5   : > { %s1792_s14 = scalar_lea.vmem %s1791_s13, 32  ;;  %p1793_p3 = scmp.lt.s32.totalorder %s1345_s29, %s1791_s13 }
 0x4f6   : > { %p1788_p0 = pnand %p1787_p13, %p1982_p5  ;;  %p1794_p4 = scmp.lt.s32.totalorder %s1792_s14, %s1786_s11 }
 0x4f8   : > { %p1789_p1 = pneg %p1788_p0  ;;  %p1795_p7 = por %p1794_p4, %p1793_p3 }
 0x4fa   : > { %p1796_p8 = pnand %p1795_p7, %p1789_p1 }
 0x4fc   : > { %1799 = shalt.err (!%p1796_p8)
}
 0x4fd   : > { %s1800_s21 = scalar_lea.hbm %s1342_s28, 16  ;;  %s1804_s19 = scalar_lea.hbm %s2439_s9, 32 }
 0x4fe   : > { %p1801_p9 = scmp.ne.s32.totalorder %s1342_s28, %s1800_s21  ;;  %p1805_p12 = scmp.lt.s32.totalorder %s1342_s28, %s2439_s9 }
 0x4ff   : > { %p1806_p13 = scmp.lt.s32.totalorder %s1804_s19, %s1800_s21 }
 0x500   : > { %p1802_p10 = pnand %p1801_p9, %p1982_p5 }
 0x501   : > { %p1807_p0 = por %p1806_p13, %p1805_p12 }
 0x502   : > { %p1803_p11 = pneg %p1802_p10 }
 0x504   : > { %p1808_p2 = pnand %p1807_p0, %p1803_p11 }
 0x506   : > { %1811 = shalt.err (!%p1808_p2)
}
 0x507   : > { %1729 = dma.vmem_to_hbm [thread:$0]  (%p1982_p5), %s1345_s29, 16, %s1342_s28, %s1329_s30  }
 0x508   : > { %s1883_s11 = smov [#allocation7]   ;;  %p2446_p3 = scmp.eq.s32.totalorder %s1963_s6, 1 }
 0x509   : > { %s1355_s12 = sshll.u32 %s1883_s11, 4  ;;  %s1356_s12 = int_to_ptr.vmem [resolvable:$true] %s1355_s12 }
 0x50a   : > { %s1812_s13 = scalar_lea.vmem %s1356_s12, 16  ;;  %s1818_s14 = scalar_lea.vmem %s1356_s12, 32 }
 0x50b   : > { %p1813_p1 = scmp.ne.s32.totalorder %s1356_s12, %s1812_s13  ;;  %p1819_p8 = scmp.lt.s32.totalorder %s1356_s12, %s1356_s12 }
 0x50c   : > { %p1820_p9 = scmp.lt.s32.totalorder %s1818_s14, %s1812_s13 }
 0x50d   : > { %p1814_p4 = pnand %p1813_p1, %p2446_p3 }
 0x50e   : > { %p1821_p10 = por %p1820_p9, %p1819_p8 }
 0x50f   : > { %p1815_p7 = pneg %p1814_p4 }
 0x511   : > { %p1822_p6 = pnand %p1821_p10, %p1815_p7 }
 0x513   : > { %1825 = shalt.err (!%p1822_p6)
}
 0x514   : > { %p2447_p2 = pmov %p2446_p3 }
 0x516   : > { %1731 = dma.vmem_to_hbm [thread:$0]  (%p2447_p2), %s1356_s12, 16, %s2440_s10, [#allocation8]  }
 0x517   : > { %p2448_p5 = pmov %p2447_p2 }
 0x518   : > { %p2449_p11 = pmov %p2447_p2 }
 0x519   : > { %1853 = dma.done.wait (%p2448_p5), [#allocation8], 16  }
 0x51a   : > { %1855 = vsyncadd (%p2449_p11), [#allocation8], 4294967280 }
 0x51b PF: > { %p1741_p12 = scmp.ge.s32.totalorder %s1874_s18, 2  ;;  %s1379_s28 = sand.u32 1, %s1862_s15  }
 0x51c   : > { %p2450_p13 = scmp.ne.s32.totalorder %s2444_s25, 0  ;;  %s1380_s29 = scalar_lea.sflag [#allocation6], %s1379_s28 }
 0x51e   : > { %p1736_p6 = pnand %p1741_p12, %p2450_p13 }
 0x520   : > { %p1737_p0 = pneg %p1736_p6 }
 0x522   : > { %1857 = dma.done.wait (%p1737_p0), %s1380_s29, 16  }
 0x523   : > { %1859 = vsyncadd (%p1737_p0), %s1380_s29, 4294967280  ;;  %p24_p1 = scmp.ge.s32.totalorder %s1967_s20, 4   ;;  %s2451_s15 = smov %s1866_s16 }
 0x524   : > { %s2452_s16 = smov %s1870_s17  ;;  %s2453_s17 = smov %s1978_s23 }
 0x525   : > { %s2454_s18 = smov %s1967_s20  ;;  %26 = sbr.rel (!%p24_p1) target bundleno = 7 (0x7), region = 127 }
 0x52a   :  { %1384 = vsyncpa [#allocation6], 1 }
 0x52b   :  { %1386 = vsyncpa [#allocation6 + $0x1], 1 }
 0x52c   :  { %1387 = vsyncpa [#allocation8], 1 }

</bundles_post_ra>
